<compile_context>
chip_gen: v6e
topology: v6e:2x2x1
jax: 0.10.0
libtpu: 0.0.40
codegen_flags: <defaults>
</compile_context>

<pallas_src>
import math

import jax
import jax.numpy as jnp
from jax.experimental import pallas as pl
from jax.experimental.pallas import tpu as pltpu

# ------------------------------- config (small) ------------------------------
N_EMBD = 32            # nx  = cfg.MODEL.N_EMBD
N_STATE = 4 * N_EMBD   # n_state (Block constructs MLP(4 * n_embd, cfg))
BS = 2
SEQ = 8

_GELU_C1 = math.sqrt(2.0 / math.pi)
_GELU_C2 = _GELU_C1 * 0.044715      # fold 0.044715 into the cubic-term coefficient


# ------------------------------ fused MLP kernel -----------------------------
def mlp_kernel(x_ref, wfc_ref, bfc_ref, wproj_ref, bproj_ref, o_ref):
    x = x_ref[...]                                                    # (M, nx)
    # c_fc: x @ W_fc + b_fc   (MXU, f32 accumulate)
    h = jnp.dot(x, wfc_ref[...], preferred_element_type=jnp.float32) + bfc_ref[...]
    # gelu(x) = 0.5*x*(1 + tanh(sqrt(2/pi)*(x + 0.044715*x^3)))
    # rewritten as inner = x*(C1 + C2*x^2) to save a vmul; tanh runs on the EUP.
    inner = h * (_GELU_C1 + _GELU_C2 * (h * h))
    h = 0.5 * h * (1.0 + jnp.tanh(inner))
    # c_proj: h @ W_proj + b_proj
    h2 = jnp.dot(h, wproj_ref[...], preferred_element_type=jnp.float32) + bproj_ref[...]
    # Dropout(cfg.MODEL.RESID_PDROP) is a no-op in eval mode.
    o_ref[...] = h2.astype(o_ref.dtype)


def mlp_forward(x, params, *, donate_input=False):
    b, n, d = x.shape
    m = b * n
    n_state = params["wfc"].shape[1]
    x2d = x.reshape(m, d)                 # Conv1D's x.view(-1, nx); free wrapper-side reshape

    itemsize = jnp.dtype(x.dtype).itemsize
    operand_bytes = (
        x2d.size + params["wfc"].size + params["bfc"].size
        + params["wproj"].size + params["bproj"].size + m * d
    ) * itemsize

    vmem = pl.BlockSpec(memory_space=pltpu.MemorySpace.VMEM)
    out2d = pl.pallas_call(
        mlp_kernel,
        out_shape=jax.ShapeDtypeStruct((m, d), x.dtype),
        in_specs=[vmem, vmem, vmem, vmem, vmem],
        out_specs=vmem,
        cost_estimate=pl.CostEstimate(
            flops=2 * m * (d * n_state) * 2,      # two matmuls: (M,nx)@(nx,ns) + (M,ns)@(ns,nx)
            transcendentals=m * n_state,          # one tanh per element of h
            bytes_accessed=operand_bytes,
        ),
        # Only valid when the caller does not read x after this call (no residual from x).
        input_output_aliases=({0: 0} if donate_input else {}),
    )(x2d, params["wfc"], params["bfc"], params["wproj"], params["bproj"])
    return out2d.reshape(b, n, d)        # view(*size_out)


# ------------------------------- parameter init ------------------------------
def init_params(key):
    k1, k2 = jax.random.split(key)
    # Conv1D init: w ~ N(0, 0.02), b = 0.  Stored (in, out) so the kernel computes x @ W.
    # Biases kept 2-D (1, nf) for a clean lane broadcast inside the kernel.
    return dict(
        wfc=jax.random.normal(k1, (N_EMBD, N_STATE), jnp.float32) * 0.02,
        bfc=jnp.zeros((1, N_STATE), jnp.float32),
        wproj=jax.random.normal(k2, (N_STATE, N_EMBD), jnp.float32) * 0.02,
        bproj=jnp.zeros((1, N_EMBD), jnp.float32),
    )


# ------------------------------ pure-JAX reference ---------------------------
def mlp_reference(x, params):
    b, n, d = x.shape
    x2d = x.reshape(b * n, d)
    h = x2d @ params["wfc"] + params["bfc"]
    h = 0.5 * h * (1.0 + jnp.tanh(_GELU_C1 * (h + 0.044715 * h ** 3)))
    h2 = h @ params["wproj"] + params["bproj"]
    return h2.reshape(b, n, d)


# ------------------------------------ main ------------------------------------
if __name__ == "__main__":
    key = jax.random.PRNGKey(0)
    pkey, xkey = jax.random.split(key)
    params = init_params(pkey)
    x = jax.random.normal(xkey, (BS, SEQ, N_EMBD), jnp.float32)

    out = jax.block_until_ready(jax.jit(mlp_forward)(x, params))

    assert out.shape == (BS, SEQ, N_EMBD)
    assert bool(jnp.all(jnp.isfinite(out)))
    ref = mlp_reference(x, params)
    assert bool(jnp.allclose(out, ref, rtol=2e-2, atol=5e-4))
    print("KERNEL_OK")
</pallas_src>

<mosaic_0001>
module attributes {stable_mosaic.version = 11 : i64} {
  func.func @mlp_kernel(%arg0: memref<16x32xf32, #tpu.memory_space<vmem>>, %arg1: memref<32x128xf32, #tpu.memory_space<vmem>>, %arg2: memref<1x128xf32, #tpu.memory_space<vmem>>, %arg3: memref<128x32xf32, #tpu.memory_space<vmem>>, %arg4: memref<1x32xf32, #tpu.memory_space<vmem>>, %arg5: memref<16x32xf32, #tpu.memory_space<vmem>>) attributes {dimension_semantics = [], scalar_prefetch = 0 : i64, scratch_operands = 0 : i64, tpu.core_type = #tpu.core_type<tc>} {
    %c0 = arith.constant 0 : index
    %c0_0 = arith.constant 0 : index
    %0 = vector.load %arg0[%c0, %c0_0] : memref<16x32xf32, #tpu.memory_space<vmem>>, vector<16x32xf32>
    %c0_1 = arith.constant 0 : index
    %c0_2 = arith.constant 0 : index
    %1 = vector.load %arg1[%c0_1, %c0_2] : memref<32x128xf32, #tpu.memory_space<vmem>>, vector<32x128xf32>
    %cst = arith.constant dense<0.000000e+00> : vector<16x128xf32>
    %2 = tpu.matmul %0, %1, %cst {dimension_numbers = #tpu.dot_dimension_numbers<[1], [0], [0], [1], [0, 0, 1, 1], [], []>} : vector<16x32xf32>, vector<32x128xf32>, vector<16x128xf32> -> vector<16x128xf32>
    %c0_3 = arith.constant 0 : index
    %c0_4 = arith.constant 0 : index
    %3 = vector.load %arg2[%c0_3, %c0_4] : memref<1x128xf32, #tpu.memory_space<vmem>>, vector<1x128xf32>
    %4 = vector.broadcast %3 : vector<1x128xf32> to vector<16x128xf32>
    %5 = arith.addf %2, %4 : vector<16x128xf32>
    %6 = arith.mulf %5, %5 : vector<16x128xf32>
    %cst_5 = arith.constant 0.0356774069 : f32
    %7 = vector.broadcast %cst_5 : f32 to vector<16x128xf32>
    %8 = arith.mulf %7, %6 : vector<16x128xf32>
    %cst_6 = arith.constant 0.797884583 : f32
    %9 = vector.broadcast %cst_6 : f32 to vector<16x128xf32>
    %10 = arith.addf %9, %8 : vector<16x128xf32>
    %11 = arith.mulf %5, %10 : vector<16x128xf32>
    %cst_7 = arith.constant 5.000000e-01 : f32
    %12 = vector.broadcast %cst_7 : f32 to vector<16x128xf32>
    %13 = arith.mulf %12, %5 : vector<16x128xf32>
    %14 = math.tanh %11 : vector<16x128xf32>
    %cst_8 = arith.constant 1.000000e+00 : f32
    %15 = vector.broadcast %cst_8 : f32 to vector<16x128xf32>
    %16 = arith.addf %15, %14 : vector<16x128xf32>
    %17 = arith.mulf %13, %16 : vector<16x128xf32>
    %c0_9 = arith.constant 0 : index
    %c0_10 = arith.constant 0 : index
    %18 = vector.load %arg3[%c0_9, %c0_10] : memref<128x32xf32, #tpu.memory_space<vmem>>, vector<128x32xf32>
    %cst_11 = arith.constant dense<0.000000e+00> : vector<16x32xf32>
    %19 = tpu.matmul %17, %18, %cst_11 {dimension_numbers = #tpu.dot_dimension_numbers<[1], [0], [0], [1], [0, 0, 1, 1], [], []>} : vector<16x128xf32>, vector<128x32xf32>, vector<16x32xf32> -> vector<16x32xf32>
    %c0_12 = arith.constant 0 : index
    %c0_13 = arith.constant 0 : index
    %20 = vector.load %arg4[%c0_12, %c0_13] : memref<1x32xf32, #tpu.memory_space<vmem>>, vector<1x32xf32>
    %21 = vector.broadcast %20 : vector<1x32xf32> to vector<16x32xf32>
    %22 = arith.addf %19, %21 : vector<16x32xf32>
    %c0_14 = arith.constant 0 : index
    %c0_15 = arith.constant 0 : index
    %23 = vector.load %arg5[%c0_14, %c0_15] : memref<16x32xf32, #tpu.memory_space<vmem>>, vector<16x32xf32>
    tpu.vector_store %arg5[%c0_14, %c0_15], %22 {strides = array<i32>} : memref<16x32xf32, #tpu.memory_space<vmem>>, vector<16x32xf32>,
    return
  }
}

</mosaic_0001>

<bundles_post_ra>
// kernel: mlp_forward.1
= control target key start
LH: loop header
LB: loop body
LE: loop exit
PB: predicated region body
PF: predicated region fallthrough
CT: control target
= control target key end

     0   :  { %vm34_vm0 = vcmask 261120   ;;  %s463_s0 = inlined_call_operand.vmem [shape: f32[16,32], index: 0, kind: input, shape index: {}]   ;;  %s464_s1 = inlined_call_operand.vmem [shape: f32[32,128], index: 1, kind: input, shape index: {}]   ;;  %s465_s2 = inlined_call_operand.vmem [shape: f32[1,128], index: 2, kind: input, shape index: {}]   ;;  %s466_s3 = inlined_call_operand.vmem [shape: f32[128,32], index: 3, kind: input, shape index: {}]   ;;  %s467_s4 = inlined_call_operand.vmem [shape: f32[1,32], index: 4, kind: input, shape index: {}]   ;;  %s468_s5 = inlined_call_operand.hbm [shape: f32[16,32], index: 5, kind: output, shape index: {}]  }
   0x1   :  { %v26_v0 = vld [vmem:[%s464_s1 + $0x18] sm:$0xff]  ;;  %v25_v1 = vld [vmem:[%s464_s1 + $0x10] sm:$0xff]  ;;  %v21_v2 = vld [vmem:[%s463_s0] sm:$0xff] }
   0x2   :  { %276 = vmatprep.subr.mxu0 %v26_v0  ;;  %v24_v3 = vld [vmem:[%s464_s1 + $0x8] sm:$0xff]  ;;  %284 = vmatprep.mubr.msk.f32.mxu0 %vm34_vm0, %v21_v2 }
   0x3   :  { %277 = vmatpush3.msra.mxu0 %v26_v0 }
   0x4   :  { %10 = vsyncpa [#allocation3], 0  ;;  %278 = vmatprep.subr.mxu0 %v25_v1  ;;  %v23_v4 = vld [vmem:[%s464_s1] sm:$0xff]  ;;  %v22_v5 = vld [vmem:[%s463_s0 + $0x8] sm:$0xff]  ;;  %s351_s10 = smov [#allocation2]  }
   0x5   :  { %279 = vmatpush3.msra.mxu0 %v25_v1  ;;  %v147_v6 = vld [vmem:[%s466_s3 + $0x78] sm:$0xff]  ;;  %v146_v7 = vld [vmem:[%s466_s3 + $0x70] sm:$0xff]  ;;  %v145_v8 = vld [vmem:[%s466_s3 + $0x68] sm:$0xff]  ;;  %s237_s11 = sshll.u32 %s351_s10, 4  ;;  %s238_s11 = int_to_ptr.vmem [resolvable:$true] %s237_s11 }
   0x6   :  { %280 = vmatprep.subr.mxu0 %v24_v3  ;;  %287 = vmatprep.subr.mxu1 %v147_v6  ;;  %v144_v9 = vld [vmem:[%s466_s3 + $0x60] sm:$0xff]  ;;  %v143_v10 = vld [vmem:[%s466_s3 + $0x58] sm:$0xff]  ;;  %v142_v11 = vld [vmem:[%s466_s3 + $0x50] sm:$0xff]  ;;  %s329_s12 = scalar_lea.vmem %s238_s11, 256  ;;  %p334_p1 = scmp.lt.s32.totalorder %s238_s11, %s238_s11 }
   0x7   :  { %281 = vmatpush3.msra.mxu0 %v24_v3  ;;  %288 = vmatpush3.msra.mxu1 %v147_v6  ;;  %v141_v12 = vld [vmem:[%s466_s3 + $0x48] sm:$0xff]  ;;  %v140_v13 = vld [vmem:[%s466_s3 + $0x40] sm:$0xff]  ;;  %v139_v14 = vld [vmem:[%s466_s3 + $0x38] sm:$0xff]  ;;  %p330_p0 = scmp.ne.s32.totalorder %s238_s11, %s329_s12  ;;  %p335_p2 = scmp.lt.s32.totalorder %s329_s12, %s329_s12 }
   0x8   :  { %282 = vmatprep.subr.mxu0 %v23_v4  ;;  %289 = vmatprep.subr.mxu1 %v146_v7  ;;  %v138_v15 = vld [vmem:[%s466_s3 + $0x30] sm:$0xff]  ;;  %v137_v16 = vld [vmem:[%s466_s3 + $0x28] sm:$0xff]  ;;  %v136_v17 = vld [vmem:[%s466_s3 + $0x20] sm:$0xff] }
   0x9   :  { %283 = vmatpush3.msra.mxu0 %v23_v4  ;;  %290 = vmatpush3.msra.mxu1 %v146_v7  ;;  %v135_v18 = vld [vmem:[%s466_s3 + $0x18] sm:$0xff]  ;;  %v134_v19 = vld [vmem:[%s466_s3 + $0x10] sm:$0xff]  ;;  %v133_v20 = vld [vmem:[%s466_s3 + $0x8] sm:$0xff]  ;;  %p336_p3 = por %p335_p2, %p334_p1 }
   0xa   :  { %285 = vmatmul.mubr.msk.f32.vlgmr.msra.gmra.mxu0 %vm34_vm0, %v22_v5  ;;  %291 = vmatprep.subr.mxu1 %v145_v8  ;;  %v132_v21 = vld [vmem:[%s466_s3] sm:$0xff] }
   0xb   :  { %292 = vmatpush3.msra.mxu1 %v145_v8  ;;  %v248_v22 = vld [vmem:[%s465_s2] ss:$0 sm:$0xff]  ;;  %p337_p4 = pnand %p336_p3, %p330_p0 }
   0xc   :  { %293 = vmatprep.subr.mxu1 %v144_v9  ;;  %v251_v43 = vld [vmem:[%s467_s4] ss:$0 sm:$0xff] }
   0xd   :  { %294 = vmatpush3.msra.mxu1 %v144_v9 }
   0xe   :  { %295 = vmatprep.subr.mxu1 %v143_v10 }
   0xf   :  { %296 = vmatpush3.msra.mxu1 %v143_v10 }
  0x10   :  { %297 = vmatprep.subr.mxu1 %v142_v11 }
  0x11   :  { %298 = vmatpush3.msra.mxu1 %v142_v11 }
  0x12   :  { %299 = vmatprep.subr.mxu1 %v141_v12 }
  0x13   :  { %300 = vmatpush3.msra.mxu1 %v141_v12 }
  0x14   :  { %301 = vmatprep.subr.mxu1 %v140_v13 }
  0x15   :  { %302 = vmatpush3.msra.mxu1 %v140_v13 }
  0x16   :  { %303 = vmatprep.subr.mxu1 %v139_v14 }
  0x17   :  { %304 = vmatpush3.msra.mxu1 %v139_v14 }
  0x18   :  { %305 = vmatprep.subr.mxu1 %v138_v15 }
  0x19   :  { %306 = vmatpush3.msra.mxu1 %v138_v15 }
  0x1a   :  { %307 = vmatprep.subr.mxu1 %v137_v16 }
  0x1b   :  { %308 = vmatpush3.msra.mxu1 %v137_v16 }
  0x1c   :  { %309 = vmatprep.subr.mxu1 %v136_v17 }
  0x1d   :  { %310 = vmatpush3.msra.mxu1 %v136_v17 }
  0x1e   :  { %311 = vmatprep.subr.mxu1 %v135_v18 }
  0x1f   :  { %312 = vmatpush3.msra.mxu1 %v135_v18 }
  0x20   :  { %313 = vmatprep.subr.mxu1 %v134_v19 }
  0x21   :  { %314 = vmatpush3.msra.mxu1 %v134_v19 }
  0x22   :  { %315 = vmatprep.subr.mxu1 %v133_v20 }
  0x23   :  { %316 = vmatpush3.msra.mxu1 %v133_v20 }
  0x24   :  { %317 = vmatprep.subr.mxu1 %v132_v21 }
  0x25   :  { %318 = vmatpush3.msra.mxu1 %v132_v21 }
  0xca   :  { %v286_v23 = vpop.f32.mrf.mxu0 }
  0xcb   :  { %v113_v24 = vadd.f32 %v286_v23, %v248_v22 }
  0xcc   :  { %v107_v25 = vpop.f32.mrf.mxu0 }
  0xcd   :  { %v117_v26 = vmul.f32 %v113_v24, %v113_v24  ;;  %v108_v27 = vadd.f32 %v248_v22, %v107_v25  ;;  %v125_v40 = vmul.f32 0.5, %v113_v24 }
  0xcf   :  { %v119_v28 = vmul.f32 0.035677407, %v117_v26  ;;  %v116_v29 = vmul.f32 %v108_v27, %v108_v27  ;;  %v124_v38 = vmul.f32 0.5, %v108_v27 }
  0xd1   :  { %v121_v30 = vadd.f32 0.7978846, %v119_v28  ;;  %v118_v31 = vmul.f32 0.035677407, %v116_v29 }
  0xd3   :  { %v123_v32 = vmul.f32 %v121_v30, %v113_v24  ;;  %v120_v33 = vadd.f32 0.7978846, %v118_v31 }
  0xd5   :  { %325 = vtanh.f32 %v123_v32  ;;  %v122_v34 = vmul.f32 %v120_v33, %v108_v27 }
  0xd7   :  { %327 = vtanh.f32 %v122_v34 }
  0xe2   :  { %v326_v35 = vpop.eup %325 }
  0xe3   :  { %v129_v37 = vadd.f32 1.0, %v326_v35 }
  0xe4   :  { %v328_v36 = vpop.eup %327 }
  0xe5   :  { %v128_v39 = vadd.f32 1.0, %v328_v36  ;;  %v131_v42 = vmul.f32 %v129_v37, %v125_v40 }
  0xe7   :  { %v130_v41 = vmul.f32 %v128_v39, %v124_v38 }
  0xe9   :  { %319 = vmatprep.mubr.f32.mxu1 %v130_v41 }
  0xea   :  { %320 = vmatmul.mubr.f32.vlgmr.msra.gmra.mxu1 %v131_v42 }
 0x1aa   :  { %v321_v44 = vpop.f32.mrf.mxu1 }
 0x1ab   :  { %v227_v45 = vadd.f32 %v321_v44, %v251_v43 }
 0x1ac   :  { %v221_v46 = vpop.f32.mrf.mxu1 }
 0x1ad   :  { %231 = vst.msk [vmem:[#allocation2 + $0x8] sm:$0xff] %vm34_vm0, %v227_v45  ;;  %v222_v47 = vadd.f32 %v251_v43, %v221_v46 }
 0x1af   :  { %230 = vst.msk [vmem:[#allocation2] sm:$0xff] %vm34_vm0, %v222_v47 }
 0x1b0   :  { %340 = shalt.err (!%p337_p4)
}
 0x1b1   :  { %s352_s13 = smov 128   ;;  %s353_s4 = smov 8  }
 0x1b2   :  { %243 = dma.vmem_to_hbm [thread:$0]  %s238_s11, 256, %s468_s5, [#allocation3], %s352_s13, %s352_s13, %s353_s4  }
 0x1b3   :  { %349 = dma.done.wait [#allocation3], 256  }
 0x1b4   :  { %350 = vsyncadd [#allocation3], 4294967040 }
 0x1b5   :  { %247 = vsyncpa [#allocation3], 1 }

</bundles_post_ra>
